<compile_context>
chip_gen: v5e
topology: v5e:2x2
jax: 0.10.0
libtpu: 0.0.40
codegen_flags: <defaults>
</compile_context>

<pallas_src>
import functools

import jax
import jax.numpy as jnp
from jax.experimental import pallas as pl
from jax.experimental.pallas import tpu as pltpu


def _round_up(a: int, b: int) -> int:
    return (a + b - 1) // b * b


def _cdiv(a: int, b: int) -> int:
    return (a + b - 1) // b


def _scaled_linear_kernel(x_ref, w_ref, b_ref, o_ref):
    # x_ref: (TM, H)   w_ref: (H, O_pad)  (normalization pre-folded)   b_ref: (1, O_pad)
    acc = jnp.dot(x_ref[...], w_ref[...], preferred_element_type=jnp.float32)
    o_ref[...] = (acc + b_ref[...]).astype(o_ref.dtype)


@functools.partial(jax.jit, static_argnames=("tm_target",))
def scaled_model_forward(x, mean, std, w, b, *, tm_target: int = 512):
    """Replicates ScaledModel.forward with inner model = Linear.

    x    : (B, H) or (B, S, H)
    mean : (H,) float32
    std  : (H,) float32
    w    : (O, H) float32  (PyTorch Linear weight layout)
    b    : (O,)  float32
    """
    if x.ndim == 2:
        x2d = x
        out_shape_final = (x.shape[0], w.shape[0])
    elif x.ndim == 3:
        x2d = x.reshape(-1, x.shape[-1])
        out_shape_final = (x.shape[0], x.shape[1], w.shape[0])
    else:
        raise ValueError(f"Unsupported input shape {x.shape}")

    M, H = x2d.shape
    O = w.shape[0]
    out_dtype = x2d.dtype
    isz = jnp.dtype(out_dtype).itemsize

    # ---- fold normalization into the linear layer (wrapper-side, O(H*O) work) ----
    mean32 = mean.astype(jnp.float32)
    inv_std = 1.0 / jnp.maximum(std.astype(jnp.float32), 1e-8)   # torch.clamp(min=1e-8)
    w_t = jnp.transpose(w).astype(jnp.float32)                    # (H, O)
    w_fold = w_t * inv_std[:, None]                               # (H, O)
    b_fold = b.astype(jnp.float32) - (mean32 * inv_std) @ w_t     # (O,)

    # ---- pad output/N dimension to a lane-dense multiple of 128 ----
    O_pad = _round_up(max(O, 128), 128)
    if O_pad != O:
        w_fold = jnp.pad(w_fold, ((0, 0), (0, O_pad - O)))
        b_fold = jnp.pad(b_fold, (0, O_pad - O))
    b_fold2d = b_fold.reshape(1, O_pad)
    w_fold = w_fold.astype(out_dtype)

    # ---- choose the M (row) tile ----
    # (1) VMEM budget: double-buffered x/out streams + (conservatively double-buffered)
    #     resident weights must fit well inside the default scoped-VMEM limit.
    budget = 24 * 1024 * 1024
    resident = 2 * H * O_pad * isz + 2 * O_pad * 4
    per_row = 2 * (H + O_pad) * isz
    vmem_tm_cap = max(8, ((budget - resident) // max(per_row, 1)) // 8 * 8)
    tm_cap = min(tm_target, vmem_tm_cap)

    # (2) minimal row padding: split M into n_tiles tiles of (8-aligned) size TM <= ~tm_cap.
    M8 = _round_up(M, 8)
    n_tiles = _cdiv(M8, tm_cap)
    TM = _round_up(_cdiv(M8, n_tiles), 8)
    M_pad = TM * n_tiles
    x_p = x2d if M_pad == M else jnp.pad(x2d, ((0, M_pad - M), (0, 0)))

    grid = (n_tiles,)
    cost = pl.CostEstimate(
        flops=2 * M_pad * H * O_pad,
        transcendentals=0,
        bytes_accessed=(M_pad * H + H * O_pad + M_pad * O_pad) * isz + O_pad * 4,
    )

    out2d = pl.pallas_call(
        _scaled_linear_kernel,
        out_shape=jax.ShapeDtypeStruct((M_pad, O_pad), out_dtype),
        grid=grid,
        in_specs=[
            pl.BlockSpec((TM, H), lambda i: (i, 0)),       # x tile (streamed, double-buffered)
            pl.BlockSpec((H, O_pad), lambda i: (0, 0)),    # folded W^T (VMEM-resident)
            pl.BlockSpec((1, O_pad), lambda i: (0, 0)),    # folded bias (VMEM-resident)
        ],
        out_specs=pl.BlockSpec((TM, O_pad), lambda i: (i, 0)),
        compiler_params=pltpu.CompilerParams(
            dimension_semantics=("parallel",)),            # sharded across TCs on v7x
        cost_estimate=cost,
    )(x_p, w_fold, b_fold2d)

    # TODO(synk): if H grows large in the real model, add a K grid axis with a
    # (TM, O_pad) f32 VMEM accumulator (pl.when init/finalize) to keep VMEM flat.

    return out2d[:M, :O].reshape(out_shape_final)


def _reference(x, mean, std, w, b):
    std_c = jnp.maximum(std, 1e-8)
    if x.ndim == 2:
        xn = (x - mean) / std_c
    else:
        xn = (x - mean[None, None, :]) / std_c[None, None, :]
    return jnp.einsum("...h,oh->...o", xn, w) + b


if __name__ == "__main__":
    key = jax.random.PRNGKey(0)
    B, S, H, O = 2, 8, 32, 16

    k_x, k_m, k_s, k_w, k_b, k_x2 = jax.random.split(key, 6)
    x3 = jax.random.normal(k_x, (B, S, H), dtype=jnp.float32)        # 3-D path
    x2 = jax.random.normal(k_x2, (B, H), dtype=jnp.float32)          # 2-D path
    mean = jax.random.normal(k_m, (H,), dtype=jnp.float32)
    std = jnp.abs(jax.random.normal(k_s, (H,), dtype=jnp.float32)) + 0.1
    w = jax.random.normal(k_w, (O, H), dtype=jnp.float32) * 0.1       # Linear weight
    b = jax.random.normal(k_b, (O,), dtype=jnp.float32) * 0.1         # Linear bias

    y3 = jax.block_until_ready(scaled_model_forward(x3, mean, std, w, b))
    y2 = jax.block_until_ready(scaled_model_forward(x2, mean, std, w, b))

    ref3 = _reference(x3, mean, std, w, b)
    ref2 = _reference(x2, mean, std, w, b)

    assert y3.shape == (B, S, O) and y2.shape == (B, O)
    # Folding 1/std into W reorders the divide/multiply -> tiny float drift.
    assert jnp.allclose(y3, ref3, atol=1e-3, rtol=1e-3)
    assert jnp.allclose(y2, ref2, atol=1e-3, rtol=1e-3)

    print("KERNEL_OK")
</pallas_src>

<mosaic_0001>
module attributes {stable_mosaic.version = 11 : i64} {
  func.func @_scaled_linear_kernel(%arg0: i32, %arg1: memref<16x32xf32, #tpu.memory_space<vmem>>, %arg2: memref<32x128xf32, #tpu.memory_space<vmem>>, %arg3: memref<1x128xf32, #tpu.memory_space<vmem>>, %arg4: memref<16x128xf32, #tpu.memory_space<vmem>>) attributes {dimension_semantics = [#tpu.dimension_semantics<parallel>], iteration_bounds = array<i64: 1>, scalar_prefetch = 0 : i64, scratch_operands = 0 : i64, tpu.core_type = #tpu.core_type<tc>, window_params = [{transform_indices = @transform_0, window_bounds = array<i64: 16, 32>}, {pipeline_mode = #tpu.pipeline_mode<synchronous>, transform_indices = @transform_1, window_bounds = array<i64: 32, 128>}, {pipeline_mode = #tpu.pipeline_mode<synchronous>, transform_indices = @transform_2, window_bounds = array<i64: 1, 128>}, {transform_indices = @transform_3, window_bounds = array<i64: 16, 128>}]} {
    %c0 = arith.constant 0 : index
    %c0_0 = arith.constant 0 : index
    %0 = vector.load %arg1[%c0, %c0_0] : memref<16x32xf32, #tpu.memory_space<vmem>>, vector<16x32xf32>
    %c0_1 = arith.constant 0 : index
    %c0_2 = arith.constant 0 : index
    %1 = vector.load %arg2[%c0_1, %c0_2] : memref<32x128xf32, #tpu.memory_space<vmem>>, vector<32x128xf32>
    %cst = arith.constant dense<0.000000e+00> : vector<16x128xf32>
    %2 = tpu.matmul %0, %1, %cst {dimension_numbers = #tpu.dot_dimension_numbers<[1], [0], [0], [1], [0, 0, 1, 1], [], []>} : vector<16x32xf32>, vector<32x128xf32>, vector<16x128xf32> -> vector<16x128xf32>
    %c0_3 = arith.constant 0 : index
    %c0_4 = arith.constant 0 : index
    %3 = vector.load %arg3[%c0_3, %c0_4] : memref<1x128xf32, #tpu.memory_space<vmem>>, vector<1x128xf32>
    %4 = vector.broadcast %3 : vector<1x128xf32> to vector<16x128xf32>
    %5 = arith.addf %2, %4 : vector<16x128xf32>
    %c0_5 = arith.constant 0 : index
    %c0_6 = arith.constant 0 : index
    %6 = vector.load %arg4[%c0_5, %c0_6] : memref<16x128xf32, #tpu.memory_space<vmem>>, vector<16x128xf32>
    tpu.vector_store %arg4[%c0_5, %c0_6], %5 {strides = array<i32>} : memref<16x128xf32, #tpu.memory_space<vmem>>, vector<16x128xf32>,
    return
  }
  func.func @transform_0(%arg0: i32) -> (i32, i32) {
    %c0_i32 = arith.constant 0 : i32
    %c0_i32_0 = arith.constant 0 : i32
    return %arg0, %c0_i32 : i32, i32
  }
  func.func @transform_1(%arg0: i32) -> (i32, i32) {
    %c0_i32 = arith.constant 0 : i32
    %c0_i32_0 = arith.constant 0 : i32
    %c0_i32_1 = arith.constant 0 : i32
    return %c0_i32, %c0_i32_0 : i32, i32
  }
  func.func @transform_2(%arg0: i32) -> (i32, i32) {
    %c0_i32 = arith.constant 0 : i32
    %c0_i32_0 = arith.constant 0 : i32
    %c0_i32_1 = arith.constant 0 : i32
    return %c0_i32, %c0_i32_0 : i32, i32
  }
  func.func @transform_3(%arg0: i32) -> (i32, i32) {
    %c0_i32 = arith.constant 0 : i32
    %c0_i32_0 = arith.constant 0 : i32
    return %arg0, %c0_i32 : i32, i32
  }
}

</mosaic_0001>

<bundles_post_ra>
// kernel: sub.1
= control target key start
LH: loop header
LB: loop body
LE: loop exit
PB: predicated region body
PF: predicated region fallthrough
CT: control target
= control target key end

     0   :  { %s34_s0 = inlined_call_operand.vmem [shape: f32[16], index: 0, kind: input, shape index: {}]   ;;  %s35_s1 = inlined_call_operand.vmem [shape: f32[16], index: 1, kind: input, shape index: {}]   ;;  %s36_s2 = inlined_call_operand.vmem [shape: f32[16], index: 2, kind: output, shape index: {}]  }
   0x1   :  { %v3_v0 = vld [vmem:[%s34_s0] sm:$0x1] }
   0x2   :  { %v4_v1 = vld [vmem:[%s35_s1] sm:$0x1] }
   0x3   :  { %v7_v2 = vsub.f32 %v3_v0, %v4_v1 }
   0x5   :  { %9 = vst [vmem:[%s36_s2] sm:$0x1] %v7_v2 }

// kernel: scaled_model_forward.1
= control target key start
LH: loop header
LB: loop body
LE: loop exit
PB: predicated region body
PF: predicated region fallthrough
CT: control target
= control target key end

     0   :  { %vm24_vm0 = vcmask 261120   ;;  %s114_s1 = inlined_call_operand.vmem [shape: f32[32,128], index: 1, kind: input, shape index: {}]   ;;  %s115_s2 = inlined_call_operand.vmem [shape: f32[1,128], index: 2, kind: input, shape index: {}]   ;;  %s116_s0 = inlined_call_operand.vmem [shape: f32[16,32], index: 0, kind: input, shape index: {}]   ;;  %s117_s3 = inlined_call_operand.vmem [shape: f32[16,128], index: 3, kind: output, shape index: {}]  }
   0x1   :  { %v19_v0 = vld [vmem:[%s114_s1 + $0x18] sm:$0xff]  ;;  %v18_v1 = vld [vmem:[%s114_s1 + $0x10] sm:$0xff]  ;;  %v17_v2 = vld [vmem:[%s114_s1 + $0x8] sm:$0xff] }
   0x2   :  { %43 = vmatpush.msra.mxu0 %v19_v0  ;;  %62 = vmatpush.msra.mxu1 %v19_v0  ;;  %v16_v3 = vld [vmem:[%s114_s1] sm:$0xff]  ;;  %v15_v5 = vld [vmem:[%s116_s0 + $0x8] sm:$0xff] }
   0x3   :  { %v14_v4 = vld [vmem:[%s116_s0] sm:$0xff] }
   0x4   :  { %44 = vmatpush.msra.mxu0 %v18_v1  ;;  %63 = vmatpush.msra.mxu1 %v18_v1  ;;  %v66_v6 = vld [vmem:[%s115_s2] ss:$0 sm:$0xff] }
   0x6   :  { %45 = vmatpush.msra.mxu0 %v17_v2  ;;  %64 = vmatpush.msra.mxu1 %v17_v2 }
   0x8   :  { %46 = vmatpush.msra.mxu0 %v16_v3  ;;  %65 = vmatpush.msra.mxu1 %v16_v3 }
   0x9   :  { %60 = vmatmul.msk.f32.vlgmr.msra.gmra.mxu0 %vm24_vm0, %v14_v4  ;;  %61 = vmatmul.msk.f32.vlgmr.msra.gmra.mxu1 %vm24_vm0, %v15_v5 }
  0x86   :  { %v48_v7 = vpop.f32.mrf.mxu0  ;;  %v51_v8 = vpop.f32.mrf.mxu1 }
  0x87   :  { %v49_v9 = vadd.f32 %v66_v6, %v48_v7  ;;  %v52_v10 = vadd.f32 %v66_v6, %v51_v8 }
  0x89   :  { %54 = vst [vmem:[%s117_s3] sm:$0xff] %v49_v9 }
  0x8a   :  { %55 = vst [vmem:[%s117_s3 + $0x8] sm:$0xff] %v52_v10 }

</bundles_post_ra>
